<compile_context>
chip_gen: v6e
topology: v6e:2x2x1
jax: 0.10.0
libtpu: 0.0.40
codegen_flags: <defaults>
</compile_context>

<pallas_src>
import functools

import jax
import jax.numpy as jnp
from jax.experimental import pallas as pl
from jax.experimental.pallas import tpu as pltpu

_LANES = 128


def _round_up(x, m):
    return ((x + m - 1) // m) * m


def _pick_vmem_limit(est_bytes):
    """Scoped-VMEM limit: generous for the blocks we use, ~25% headroom left
    for Mosaic internal scratch / double-buffering, never the full physical
    VMEM (48 MiB cap on v7x, 96 MiB on v5e/v6e)."""
    cap = 64 * 1024 * 1024  # conservative fallback = v7x per-TC physical VMEM
    try:
        info = pltpu.get_tpu_info()
        cap = int(getattr(info, "vmem_capacity_bytes", cap) or cap)
    except Exception:
        pass
    limit = int(est_bytes * 1.25) + (8 << 20)
    return int(min(max(limit, 32 << 20), int(cap * 0.75)))


# ---------------------------------------------------------------------------
# Kernel: one (n, do, j, kd) grid step.
# ---------------------------------------------------------------------------
def _conv3d_tap_kernel(x_ref, w_ref, b_ref, o_ref, *, K, Wp, Lp):
    """
    x_ref: (R, Cin)             compute dtype, flattened padded depth slab
    w_ref: (K*K*K, Cin, tn)     compute dtype, ALL taps (resident in VMEM)
    b_ref: (1, tn)              f32 bias tile
    o_ref: (Lp, tn)             f32 output block, resident across kd -> used as
                                the accumulator (no scratch, no finalize copy)
    """
    kd = pl.program_id(3)

    @pl.when(kd == 0)
    def _init():
        # Initialise the resident output block with the bias (instead of zeros
        # + a later add/copy).
        o_ref[...] = jnp.broadcast_to(b_ref[...], o_ref.shape)

    acc = o_ref[...]
    # Unrolled loop over the K*K in-plane taps: each is a static contiguous
    # 2-D slice of the flattened slab matmul'd on the MXU against that tap's
    # (Cin, tn) weight slice, accumulated in f32.
    for kh in range(K):
        for kw in range(K):
            base = kh * Wp + kw                       # static row offset
            lhs = x_ref[base:base + Lp, :]            # (Lp, Cin)
            rhs = w_ref[kd * (K * K) + kh * K + kw]   # (Cin, tn), dynamic kd
            acc = acc + jnp.dot(lhs, rhs, preferred_element_type=jnp.float32)
    o_ref[...] = acc


# ---------------------------------------------------------------------------
# Conv3dLayer forward (matches nn.Conv3d: NCDHW in / NCDHW out)
# ---------------------------------------------------------------------------
@functools.partial(jax.jit, static_argnames=("stride", "padding", "compute_dtype"))
def conv3d_layer_forward(x_ncdhw, weight, bias, *, stride=1, padding=0,
                         compute_dtype=jnp.bfloat16):
    """x: (N, Cin, D, H, W); weight: (Cout, Cin, K, K, K); bias: (Cout,)."""
    N, Cin, D, H, W = x_ncdhw.shape
    Cout, _, K, _, _ = weight.shape
    s, p = stride, padding

    Do = (D + 2 * p - K) // s + 1
    Ho = (H + 2 * p - K) // s + 1
    Wo = (W + 2 * p - K) // s + 1
    Dp, Hp, Wp = D + 2 * p, H + 2 * p, W + 2 * p

    # Lane-dense Cout, optionally tiled (256-wide RHS fills v6e/v7x MXU).
    Cout_p = _round_up(Cout, _LANES)
    tn = 256 if (Cout_p % 256 == 0) else _LANES
    J = Cout_p // tn

    # Flattened-row trick: output position (ho, wo) sits at local offset
    # s*(ho*Wp + wo) inside every tap's contiguous row window of length L.
    # TODO(synk): for stride > 1, compact rows before the matmul (M = Ho*Wo).
    L = s * ((Ho - 1) * Wp + (Wo - 1)) + 1
    Lp = _round_up(L, 8)
    R = (K - 1) * (Wp + 1) + Lp            # rows incl. slack for every tap
    Rfull = max(R, Hp * Wp)

    # NCDHW -> NDHWC, zero-pad spatially, flatten (H, W), add row slack.
    x = jnp.transpose(x_ncdhw, (0, 2, 3, 4, 1))
    xp = jnp.pad(x, ((0, 0), (p, p), (p, p), (p, p), (0, 0)))
    x2 = xp.reshape(N, Dp, Hp * Wp, Cin)
    x2 = jnp.pad(x2, ((0, 0), (0, 0), (0, Rfull - Hp * Wp), (0, 0)))
    x2 = x2.astype(compute_dtype)

    # weight (Cout, Cin, K, K, K) -> (K*K*K, Cin, Cout_p), tap-major (kd,kh,kw).
    w = jnp.transpose(weight, (2, 3, 4, 1, 0)).reshape(K * K * K, Cin, Cout)
    w = jnp.pad(w, ((0, 0), (0, 0), (0, Cout_p - Cout))).astype(compute_dtype)
    b2 = jnp.pad(bias, (0, Cout_p - Cout)).astype(jnp.float32).reshape(1, Cout_p)

    bpe = jnp.dtype(compute_dtype).itemsize
    vmem_est = (2 * Rfull * Cin * bpe            # input slab (double-buffered)
                + 2 * (K ** 3) * Cin * tn * bpe  # resident weight tile
                + 2 * tn * 4                     # bias tile
                + 2 * Lp * tn * 4)               # f32 output block
    vmem_limit = _pick_vmem_limit(vmem_est)

    kernel = functools.partial(_conv3d_tap_kernel, K=K, Wp=Wp, Lp=Lp)

    out2 = pl.pallas_call(
        kernel,
        out_shape=jax.ShapeDtypeStruct((N, Do, Lp, Cout_p), jnp.float32),
        grid_spec=pltpu.PrefetchScalarGridSpec(
            num_scalar_prefetch=0,
            grid=(N, Do, J, K),                  # (batch, out-depth, Cout tile, depth tap)
            in_specs=[
                # One flattened depth slab of the padded input per step.
                pl.BlockSpec((None, None, Rfull, Cin),
                             lambda n, do, j, kd: (n, do * s + kd, 0, 0)),
                # ALL taps' weights for this Cout tile -> resident across
                # (n, do, kd); one DMA per Cout tile for the whole kernel.
                pl.BlockSpec((K * K * K, Cin, tn),
                             lambda n, do, j, kd: (0, 0, j)),
                # Bias tile, resident.
                pl.BlockSpec((1, tn), lambda n, do, j, kd: (0, j)),
            ],
            # Output block index constant across kd -> stays resident in VMEM
            # and doubles as the f32 accumulator (no scratch needed).
            out_specs=pl.BlockSpec((None, None, Lp, tn),
                                   lambda n, do, j, kd: (n, do, 0, j)),
        ),
        compiler_params=pltpu.CompilerParams(
            dimension_semantics=("parallel", "parallel", "parallel", "arbitrary"),
            vmem_limit_bytes=vmem_limit,
        ),
    )(x2, w, b2)

    # Gather the valid output rows (tap-independent offsets), drop Cout pad,
    # and restore NCDHW.  Cheap XLA glue on the (small) real output.
    # TODO(synk): in a multi-layer network keep activations NDHWC / bf16 across
    #             layers so this transpose/pad/cast glue doesn't run per layer.
    row_idx = (s * (jnp.arange(Ho)[:, None] * Wp
                    + jnp.arange(Wo)[None, :])).reshape(-1)
    out = jnp.take(out2, row_idx, axis=2)[..., :Cout]       # (N, Do, Ho*Wo, Cout)
    out = out.reshape(N, Do, Ho, Wo, Cout)
    return jnp.transpose(out, (0, 4, 1, 2, 3))              # (N, Cout, Do, Ho, Wo)


# ---------------------------------------------------------------------------
# Demo / self-test
# ---------------------------------------------------------------------------
if __name__ == "__main__":
    # Conv3dLayer(in_channels=4, out_channels=8, kernel_size=3, stride=1, padding=1)
    in_channels, out_channels, kernel_size, stride, padding = 4, 8, 3, 1, 1
    N, D, H, W = 2, 8, 8, 8

    key = jax.random.PRNGKey(0)
    kx, kw, kb = jax.random.split(key, 3)

    x = jax.random.normal(kx, (N, in_channels, D, H, W), dtype=jnp.float32)
    fan_in = in_channels * kernel_size ** 3
    weight = jax.random.normal(
        kw, (out_channels, in_channels, kernel_size, kernel_size, kernel_size),
        dtype=jnp.float32) * (1.0 / fan_in) ** 0.5
    bias = jax.random.normal(kb, (out_channels,), dtype=jnp.float32) * 0.01

    out = conv3d_layer_forward(x, weight, bias, stride=stride, padding=padding)
    out = jax.block_until_ready(out)

    # Reference: XLA conv with identical semantics to nn.Conv3d (f32).
    ref = jax.lax.conv_general_dilated(
        x, weight,
        window_strides=(stride,) * 3,
        padding=[(padding, padding)] * 3,
        dimension_numbers=("NCDHW", "OIDHW", "NCDHW"),
    ) + bias.reshape(1, out_channels, 1, 1, 1)
    ref = jax.block_until_ready(ref)

    assert out.shape == ref.shape, (out.shape, ref.shape)
    assert jnp.allclose(out, ref, rtol=2e-2, atol=2e-2), float(
        jnp.max(jnp.abs(out - ref)))

    print("KERNEL_OK")
</pallas_src>

<mosaic_0001>
module attributes {stable_mosaic.version = 11 : i64} {
  func.func @_conv3d_tap_kernel(%arg0: i32, %arg1: i32, %arg2: i32, %arg3: i32, %arg4: memref<1x1x102x4xbf16, #tpu.memory_space<vmem>>, %arg5: memref<27x4x128xbf16, #tpu.memory_space<vmem>>, %arg6: memref<1x128xf32, #tpu.memory_space<vmem>>, %arg7: memref<1x1x80x128xf32, #tpu.memory_space<vmem>>) attributes {dimension_semantics = [#tpu.dimension_semantics<parallel>, #tpu.dimension_semantics<parallel>, #tpu.dimension_semantics<parallel>, #tpu.dimension_semantics<arbitrary>], iteration_bounds = array<i64: 2, 8, 1, 3>, scalar_prefetch = 0 : i64, scratch_operands = 0 : i64, tpu.core_type = #tpu.core_type<tc>, window_params = [{transform_indices = @transform_0, window_bounds = array<i64: 1, 1, 102, 4>}, {transform_indices = @transform_1, window_bounds = array<i64: 27, 4, 128>}, {transform_indices = @transform_2, window_bounds = array<i64: 1, 128>}, {transform_indices = @transform_3, window_bounds = array<i64: 1, 1, 80, 128>}]} {
    %c0_i32 = arith.constant 0 : i32
    %0 = arith.cmpi eq, %arg3, %c0_i32 : i32
    %1 = arith.extui %0 : i1 to i32
    %c0_i32_0 = arith.constant 0 : i32
    %2 = arith.cmpi ne, %1, %c0_i32_0 : i32
    scf.if %2 {
      %c0_84 = arith.constant 0 : index
      %c0_85 = arith.constant 0 : index
      %98 = vector.load %arg6[%c0_84, %c0_85] : memref<1x128xf32, #tpu.memory_space<vmem>>, vector<1x128xf32>
      %99 = vector.shape_cast %98 : vector<1x128xf32> to vector<1x128xf32>
      %100 = vector.broadcast %99 : vector<1x128xf32> to vector<80x128xf32>
      %c0_86 = arith.constant 0 : index
      %c0_87 = arith.constant 0 : index
      %c0_88 = arith.constant 0 : index
      %c0_89 = arith.constant 0 : index
      %101 = vector.load %arg7[%c0_86, %c0_87, %c0_88, %c0_89] : memref<1x1x80x128xf32, #tpu.memory_space<vmem>>, vector<1x1x80x128xf32>
      %102 = vector.shape_cast %101 : vector<1x1x80x128xf32> to vector<80x128xf32>
      %103 = vector.shape_cast %100 : vector<80x128xf32> to vector<1x1x80x128xf32>
      tpu.vector_store %arg7[%c0_86, %c0_87, %c0_88, %c0_89], %103 {strides = array<i32>} : memref<1x1x80x128xf32, #tpu.memory_space<vmem>>, vector<1x1x80x128xf32>,
    } else {
    }
    %c0 = arith.constant 0 : index
    %c0_1 = arith.constant 0 : index
    %c0_2 = arith.constant 0 : index
    %c0_3 = arith.constant 0 : index
    %3 = vector.load %arg7[%c0, %c0_1, %c0_2, %c0_3] : memref<1x1x80x128xf32, #tpu.memory_space<vmem>>, vector<1x1x80x128xf32>
    %4 = vector.shape_cast %3 : vector<1x1x80x128xf32> to vector<80x128xf32>
    %c0_4 = arith.constant 0 : index
    %c0_5 = arith.constant 0 : index
    %c0_6 = arith.constant 0 : index
    %c0_7 = arith.constant 0 : index
    %5 = vector.load %arg4[%c0_4, %c0_5, %c0_6, %c0_7] : memref<1x1x102x4xbf16, #tpu.memory_space<vmem>>, vector<1x1x80x4xbf16>
    %6 = vector.shape_cast %5 : vector<1x1x80x4xbf16> to vector<80x4xbf16>
    %c9_i32 = arith.constant 9 : i32
    %7 = arith.muli %arg3, %c9_i32 : i32
    %c0_i32_8 = arith.constant 0 : i32
    %8 = arith.addi %7, %c0_i32_8 : i32
    %c0_i32_9 = arith.constant 0 : i32
    %9 = arith.addi %8, %c0_i32_9 : i32
    %10 = arith.index_cast %9 : i32 to index
    %c0_10 = arith.constant 0 : index
    %c0_11 = arith.constant 0 : index
    %11 = vector.load %arg5[%10, %c0_10, %c0_11] : memref<27x4x128xbf16, #tpu.memory_space<vmem>>, vector<1x4x128xbf16>
    %12 = vector.shape_cast %11 : vector<1x4x128xbf16> to vector<4x128xbf16>
    %cst = arith.constant dense<0.000000e+00> : vector<80x128xf32>
    %13 = tpu.matmul %6, %12, %cst {dimension_numbers = #tpu.dot_dimension_numbers<[1], [0], [0], [1], [0, 0, 1, 1], [], []>} : vector<80x4xbf16>, vector<4x128xbf16>, vector<80x128xf32> -> vector<80x128xf32>
    %14 = arith.addf %4, %13 : vector<80x128xf32>
    %c0_12 = arith.constant 0 : index
    %c0_13 = arith.constant 0 : index
    %c1 = arith.constant 1 : index
    %c0_14 = arith.constant 0 : index
    %15 = vector.load %arg4[%c0_12, %c0_13, %c1, %c0_14] : memref<1x1x102x4xbf16, #tpu.memory_space<vmem>>, vector<1x1x80x4xbf16>
    %16 = vector.shape_cast %15 : vector<1x1x80x4xbf16> to vector<80x4xbf16>
    %c9_i32_15 = arith.constant 9 : i32
    %17 = arith.muli %arg3, %c9_i32_15 : i32
    %c0_i32_16 = arith.constant 0 : i32
    %18 = arith.addi %17, %c0_i32_16 : i32
    %c1_i32 = arith.constant 1 : i32
    %19 = arith.addi %18, %c1_i32 : i32
    %20 = arith.index_cast %19 : i32 to index
    %c0_17 = arith.constant 0 : index
    %c0_18 = arith.constant 0 : index
    %21 = vector.load %arg5[%20, %c0_17, %c0_18] : memref<27x4x128xbf16, #tpu.memory_space<vmem>>, vector<1x4x128xbf16>
    %22 = vector.shape_cast %21 : vector<1x4x128xbf16> to vector<4x128xbf16>
    %cst_19 = arith.constant dense<0.000000e+00> : vector<80x128xf32>
    %23 = tpu.matmul %16, %22, %cst_19 {dimension_numbers = #tpu.dot_dimension_numbers<[1], [0], [0], [1], [0, 0, 1, 1], [], []>} : vector<80x4xbf16>, vector<4x128xbf16>, vector<80x128xf32> -> vector<80x128xf32>
    %24 = arith.addf %14, %23 : vector<80x128xf32>
    %c0_20 = arith.constant 0 : index
    %c0_21 = arith.constant 0 : index
    %c2 = arith.constant 2 : index
    %c0_22 = arith.constant 0 : index
    %25 = vector.load %arg4[%c0_20, %c0_21, %c2, %c0_22] : memref<1x1x102x4xbf16, #tpu.memory_space<vmem>>, vector<1x1x80x4xbf16>
    %26 = vector.shape_cast %25 : vector<1x1x80x4xbf16> to vector<80x4xbf16>
    %c9_i32_23 = arith.constant 9 : i32
    %27 = arith.muli %arg3, %c9_i32_23 : i32
    %c0_i32_24 = arith.constant 0 : i32
    %28 = arith.addi %27, %c0_i32_24 : i32
    %c2_i32 = arith.constant 2 : i32
    %29 = arith.addi %28, %c2_i32 : i32
    %30 = arith.index_cast %29 : i32 to index
    %c0_25 = arith.constant 0 : index
    %c0_26 = arith.constant 0 : index
    %31 = vector.load %arg5[%30, %c0_25, %c0_26] : memref<27x4x128xbf16, #tpu.memory_space<vmem>>, vector<1x4x128xbf16>
    %32 = vector.shape_cast %31 : vector<1x4x128xbf16> to vector<4x128xbf16>
    %cst_27 = arith.constant dense<0.000000e+00> : vector<80x128xf32>
    %33 = tpu.matmul %26, %32, %cst_27 {dimension_numbers = #tpu.dot_dimension_numbers<[1], [0], [0], [1], [0, 0, 1, 1], [], []>} : vector<80x4xbf16>, vector<4x128xbf16>, vector<80x128xf32> -> vector<80x128xf32>
    %34 = arith.addf %24, %33 : vector<80x128xf32>
    %c0_28 = arith.constant 0 : index
    %c0_29 = arith.constant 0 : index
    %c10 = arith.constant 10 : index
    %c0_30 = arith.constant 0 : index
    %35 = vector.load %arg4[%c0_28, %c0_29, %c10, %c0_30] : memref<1x1x102x4xbf16, #tpu.memory_space<vmem>>, vector<1x1x80x4xbf16>
    %36 = vector.shape_cast %35 : vector<1x1x80x4xbf16> to vector<80x4xbf16>
    %c9_i32_31 = arith.constant 9 : i32
    %37 = arith.muli %arg3, %c9_i32_31 : i32
    %c3_i32 = arith.constant 3 : i32
    %38 = arith.addi %37, %c3_i32 : i32
    %c0_i32_32 = arith.constant 0 : i32
    %39 = arith.addi %38, %c0_i32_32 : i32
    %40 = arith.index_cast %39 : i32 to index
    %c0_33 = arith.constant 0 : index
    %c0_34 = arith.constant 0 : index
    %41 = vector.load %arg5[%40, %c0_33, %c0_34] : memref<27x4x128xbf16, #tpu.memory_space<vmem>>, vector<1x4x128xbf16>
    %42 = vector.shape_cast %41 : vector<1x4x128xbf16> to vector<4x128xbf16>
    %cst_35 = arith.constant dense<0.000000e+00> : vector<80x128xf32>
    %43 = tpu.matmul %36, %42, %cst_35 {dimension_numbers = #tpu.dot_dimension_numbers<[1], [0], [0], [1], [0, 0, 1, 1], [], []>} : vector<80x4xbf16>, vector<4x128xbf16>, vector<80x128xf32> -> vector<80x128xf32>
    %44 = arith.addf %34, %43 : vector<80x128xf32>
    %c0_36 = arith.constant 0 : index
    %c0_37 = arith.constant 0 : index
    %c11 = arith.constant 11 : index
    %c0_38 = arith.constant 0 : index
    %45 = vector.load %arg4[%c0_36, %c0_37, %c11, %c0_38] : memref<1x1x102x4xbf16, #tpu.memory_space<vmem>>, vector<1x1x80x4xbf16>
    %46 = vector.shape_cast %45 : vector<1x1x80x4xbf16> to vector<80x4xbf16>
    %c9_i32_39 = arith.constant 9 : i32
    %47 = arith.muli %arg3, %c9_i32_39 : i32
    %c3_i32_40 = arith.constant 3 : i32
    %48 = arith.addi %47, %c3_i32_40 : i32
    %c1_i32_41 = arith.constant 1 : i32
    %49 = arith.addi %48, %c1_i32_41 : i32
    %50 = arith.index_cast %49 : i32 to index
    %c0_42 = arith.constant 0 : index
    %c0_43 = arith.constant 0 : index
    %51 = vector.load %arg5[%50, %c0_42, %c0_43] : memref<27x4x128xbf16, #tpu.memory_space<vmem>>, vector<1x4x128xbf16>
    %52 = vector.shape_cast %51 : vector<1x4x128xbf16> to vector<4x128xbf16>
    %cst_44 = arith.constant dense<0.000000e+00> : vector<80x128xf32>
    %53 = tpu.matmul %46, %52, %cst_44 {dimension_numbers = #tpu.dot_dimension_numbers<[1], [0], [0], [1], [0, 0, 1, 1], [], []>} : vector<80x4xbf16>, vector<4x128xbf16>, vector<80x128xf32> -> vector<80x128xf32>
    %54 = arith.addf %44, %53 : vector<80x128xf32>
    %c0_45 = arith.constant 0 : index
    %c0_46 = arith.constant 0 : index
    %c12 = arith.constant 12 : index
    %c0_47 = arith.constant 0 : index
    %55 = vector.load %arg4[%c0_45, %c0_46, %c12, %c0_47] : memref<1x1x102x4xbf16, #tpu.memory_space<vmem>>, vector<1x1x80x4xbf16>
    %56 = vector.shape_cast %55 : vector<1x1x80x4xbf16> to vector<80x4xbf16>
    %c9_i32_48 = arith.constant 9 : i32
    %57 = arith.muli %arg3, %c9_i32_48 : i32
    %c3_i32_49 = arith.constant 3 : i32
    %58 = arith.addi %57, %c3_i32_49 : i32
    %c2_i32_50 = arith.constant 2 : i32
    %59 = arith.addi %58, %c2_i32_50 : i32
    %60 = arith.index_cast %59 : i32 to index
    %c0_51 = arith.constant 0 : index
    %c0_52 = arith.constant 0 : index
    %61 = vector.load %arg5[%60, %c0_51, %c0_52] : memref<27x4x128xbf16, #tpu.memory_space<vmem>>, vector<1x4x128xbf16>
    %62 = vector.shape_cast %61 : vector<1x4x128xbf16> to vector<4x128xbf16>
    %cst_53 = arith.constant dense<0.000000e+00> : vector<80x128xf32>
    %63 = tpu.matmul %56, %62, %cst_53 {dimension_numbers = #tpu.dot_dimension_numbers<[1], [0], [0], [1], [0, 0, 1, 1], [], []>} : vector<80x4xbf16>, vector<4x128xbf16>, vector<80x128xf32> -> vector<80x128xf32>
    %64 = arith.addf %54, %63 : vector<80x128xf32>
    %c0_54 = arith.constant 0 : index
    %c0_55 = arith.constant 0 : index
    %c20 = arith.constant 20 : index
    %c0_56 = arith.constant 0 : index
    %65 = vector.load %arg4[%c0_54, %c0_55, %c20, %c0_56] : memref<1x1x102x4xbf16, #tpu.memory_space<vmem>>, vector<1x1x80x4xbf16>
    %66 = vector.shape_cast %65 : vector<1x1x80x4xbf16> to vector<80x4xbf16>
    %c9_i32_57 = arith.constant 9 : i32
    %67 = arith.muli %arg3, %c9_i32_57 : i32
    %c6_i32 = arith.constant 6 : i32
    %68 = arith.addi %67, %c6_i32 : i32
    %c0_i32_58 = arith.constant 0 : i32
    %69 = arith.addi %68, %c0_i32_58 : i32
    %70 = arith.index_cast %69 : i32 to index
    %c0_59 = arith.constant 0 : index
    %c0_60 = arith.constant 0 : index
    %71 = vector.load %arg5[%70, %c0_59, %c0_60] : memref<27x4x128xbf16, #tpu.memory_space<vmem>>, vector<1x4x128xbf16>
    %72 = vector.shape_cast %71 : vector<1x4x128xbf16> to vector<4x128xbf16>
    %cst_61 = arith.constant dense<0.000000e+00> : vector<80x128xf32>
    %73 = tpu.matmul %66, %72, %cst_61 {dimension_numbers = #tpu.dot_dimension_numbers<[1], [0], [0], [1], [0, 0, 1, 1], [], []>} : vector<80x4xbf16>, vector<4x128xbf16>, vector<80x128xf32> -> vector<80x128xf32>
    %74 = arith.addf %64, %73 : vector<80x128xf32>
    %c0_62 = arith.constant 0 : index
    %c0_63 = arith.constant 0 : index
    %c21 = arith.constant 21 : index
    %c0_64 = arith.constant 0 : index
    %75 = vector.load %arg4[%c0_62, %c0_63, %c21, %c0_64] : memref<1x1x102x4xbf16, #tpu.memory_space<vmem>>, vector<1x1x80x4xbf16>
    %76 = vector.shape_cast %75 : vector<1x1x80x4xbf16> to vector<80x4xbf16>
    %c9_i32_65 = arith.constant 9 : i32
    %77 = arith.muli %arg3, %c9_i32_65 : i32
    %c6_i32_66 = arith.constant 6 : i32
    %78 = arith.addi %77, %c6_i32_66 : i32
    %c1_i32_67 = arith.constant 1 : i32
    %79 = arith.addi %78, %c1_i32_67 : i32
    %80 = arith.index_cast %79 : i32 to index
    %c0_68 = arith.constant 0 : index
    %c0_69 = arith.constant 0 : index
    %81 = vector.load %arg5[%80, %c0_68, %c0_69] : memref<27x4x128xbf16, #tpu.memory_space<vmem>>, vector<1x4x128xbf16>
    %82 = vector.shape_cast %81 : vector<1x4x128xbf16> to vector<4x128xbf16>
    %cst_70 = arith.constant dense<0.000000e+00> : vector<80x128xf32>
    %83 = tpu.matmul %76, %82, %cst_70 {dimension_numbers = #tpu.dot_dimension_numbers<[1], [0], [0], [1], [0, 0, 1, 1], [], []>} : vector<80x4xbf16>, vector<4x128xbf16>, vector<80x128xf32> -> vector<80x128xf32>
    %84 = arith.addf %74, %83 : vector<80x128xf32>
    %c0_71 = arith.constant 0 : index
    %c0_72 = arith.constant 0 : index
    %c22 = arith.constant 22 : index
    %c0_73 = arith.constant 0 : index
    %85 = vector.load %arg4[%c0_71, %c0_72, %c22, %c0_73] : memref<1x1x102x4xbf16, #tpu.memory_space<vmem>>, vector<1x1x80x4xbf16>
    %86 = vector.shape_cast %85 : vector<1x1x80x4xbf16> to vector<80x4xbf16>
    %c9_i32_74 = arith.constant 9 : i32
    %87 = arith.muli %arg3, %c9_i32_74 : i32
    %c6_i32_75 = arith.constant 6 : i32
    %88 = arith.addi %87, %c6_i32_75 : i32
    %c2_i32_76 = arith.constant 2 : i32
    %89 = arith.addi %88, %c2_i32_76 : i32
    %90 = arith.index_cast %89 : i32 to index
    %c0_77 = arith.constant 0 : index
    %c0_78 = arith.constant 0 : index
    %91 = vector.load %arg5[%90, %c0_77, %c0_78] : memref<27x4x128xbf16, #tpu.memory_space<vmem>>, vector<1x4x128xbf16>
    %92 = vector.shape_cast %91 : vector<1x4x128xbf16> to vector<4x128xbf16>
    %cst_79 = arith.constant dense<0.000000e+00> : vector<80x128xf32>
    %93 = tpu.matmul %86, %92, %cst_79 {dimension_numbers = #tpu.dot_dimension_numbers<[1], [0], [0], [1], [0, 0, 1, 1], [], []>} : vector<80x4xbf16>, vector<4x128xbf16>, vector<80x128xf32> -> vector<80x128xf32>
    %94 = arith.addf %84, %93 : vector<80x128xf32>
    %c0_80 = arith.constant 0 : index
    %c0_81 = arith.constant 0 : index
    %c0_82 = arith.constant 0 : index
    %c0_83 = arith.constant 0 : index
    %95 = vector.load %arg7[%c0_80, %c0_81, %c0_82, %c0_83] : memref<1x1x80x128xf32, #tpu.memory_space<vmem>>, vector<1x1x80x128xf32>
    %96 = vector.shape_cast %95 : vector<1x1x80x128xf32> to vector<80x128xf32>
    %97 = vector.shape_cast %94 : vector<80x128xf32> to vector<1x1x80x128xf32>
    tpu.vector_store %arg7[%c0_80, %c0_81, %c0_82, %c0_83], %97 {strides = array<i32>} : memref<1x1x80x128xf32, #tpu.memory_space<vmem>>, vector<1x1x80x128xf32>,
    return
  }
  func.func @transform_0(%arg0: i32, %arg1: i32, %arg2: i32, %arg3: i32) -> (i32, i32, i32, i32) {
    %c1_i32 = arith.constant 1 : i32
    %0 = arith.muli %arg1, %c1_i32 : i32
    %1 = arith.addi %0, %arg3 : i32
    %c0_i32 = arith.constant 0 : i32
    %c0_i32_0 = arith.constant 0 : i32
    %c0_i32_1 = arith.constant 0 : i32
    return %arg0, %1, %c0_i32, %c0_i32_0 : i32, i32, i32, i32
  }
  func.func @transform_1(%arg0: i32, %arg1: i32, %arg2: i32, %arg3: i32) -> (i32, i32, i32) {
    %c0_i32 = arith.constant 0 : i32
    %c0_i32_0 = arith.constant 0 : i32
    %c0_i32_1 = arith.constant 0 : i32
    return %c0_i32, %c0_i32_0, %arg2 : i32, i32, i32
  }
  func.func @transform_2(%arg0: i32, %arg1: i32, %arg2: i32, %arg3: i32) -> (i32, i32) {
    %c0_i32 = arith.constant 0 : i32
    %c0_i32_0 = arith.constant 0 : i32
    return %c0_i32, %arg2 : i32, i32
  }
  func.func @transform_3(%arg0: i32, %arg1: i32, %arg2: i32, %arg3: i32) -> (i32, i32, i32, i32) {
    %c0_i32 = arith.constant 0 : i32
    %c0_i32_0 = arith.constant 0 : i32
    return %arg0, %arg1, %c0_i32, %arg2 : i32, i32, i32, i32
  }
}

</mosaic_0001>

<bundles_post_ra>
// kernel: conv3d_layer_forward.1
= control target key start
LH: loop header
LB: loop body
LE: loop exit
PB: predicated region body
PF: predicated region fallthrough
CT: control target
= control target key end

     0   :  { %s2341_s12 = smov 0   ;;  %s2343_s13 = smov 0   ;;  %s2832_s0 = inlined_call_operand.vmem [shape: bf16[2,10,102,4], index: 0, kind: input, shape index: {}]   ;;  %s2833_s1 = inlined_call_operand.vmem [shape: bf16[27,4,128], index: 1, kind: input, shape index: {}]   ;;  %s2834_s2 = inlined_call_operand.vmem [shape: f32[1,128], index: 2, kind: input, shape index: {}]   ;;  %s2835_s3 = inlined_call_operand.vmem [shape: f32[2,8,80,128], index: 3, kind: output, shape index: {}]  }
   0x1   :  { %s2345_s14 = smov 0   ;;  %s2347_s15 = smov 0  }
   0x2   :  { %s2349_s16 = smov 0   ;;  %s2351_s17 = smov 0  }
   0x3   :  { %s2353_s18 = smov 0  }
   0x4 LB: > { %s28_s19 = sadd.s32 1, %s2305_s15  ;;  %s35_s20 = sadd.s32 1, %s2309_s16  ;;  %s2317_s18 = sphi %s2353_s18, %s13_s18   ;;  %s2313_s17 = sphi %s2351_s17, %s2841_s17   ;;  %s2309_s16 = sphi %s2349_s16, %s2840_s16   ;;  %s2305_s15 = sphi %s2347_s15, %s2839_s15   ;;  %s2301_s14 = sphi %s2345_s14, %s2838_s14   ;;  %s2297_s13 = sphi %s2343_s13, %s2837_s13   ;;  %s2293_s12 = sphi %s2341_s12, %s2836_s12  }
   0x5   : > { %p29_p0 = scmp.ge.s32.totalorder %s28_s19, 3  ;;  %p1821_p1 = scmp.ge.s32.totalorder %s2317_s18, 1 }
   0x6   : > { %p194_p2 = scmp.lt.s32.totalorder %s2317_s18, 49  ;;  %s39_s21 = sadd.s32 1, %s2313_s17 }
   0x7   : > { %s2843_s19 = smov (%p29_p0, %s28_s19), 0  ;;  %s2845_s20 = smov (!%p29_p0, %s35_s20), %s2309_s16 }
   0x8   : > { %p195_p3 = pnand %p1821_p1, %p194_p2  ;;  %p37_p4 = scmp.ge.s32.totalorder %s2845_s20, 8 }
   0x9   : > { %s237_s22 = sadd.s32 (!%p195_p3), %s2293_s12, %s2297_s13  ;;  %p238_p6 = scmp.lt.s32.totalorder (!%p195_p3), %s2301_s14, 1 }
   0xa   : > { %s2847_s20 = smov (%p37_p4, %s2845_s20), 0  ;;  %s2849_s21 = smov (!%p37_p4, %s39_s21), %s2313_s17 }
   0xb   : > { %p41_p5 = scmp.ge.s32.totalorder %s2849_s21, 2  ;;  %198 = sbr.rel (%p195_p3) target bundleno = 416 (0x1a0), region = 32 }
   0xc   : > { %p240_p7 = scmp.lt.s32.totalorder (!%p195_p3), %s237_s22, 9  ;;  %p257_p8 = scmp.lt.s32.totalorder (!%p195_p3), %s2297_s13, 7 }
   0xd   : > { %s2851_s21 = smov (%p41_p5, %s2849_s21), 0  ;;  %p1824_p9 = scmp.ne.s32.totalorder (!%p195_p3), %s2293_s12, 0 }
  0x10   : > { %s2853_s14 = smov (!%p238_p6, %s2301_s14), 1  ;;  %s2855_s22 = smov (!%p240_p7, %s237_s22), 9 }
  0x11   : > { %s2174_s23 = smul.u32 130, %s2853_s14  ;;  %s2857_s13 = smov (!%p257_p8, %s2297_s13), 7 }
  0x12   : > { %s2173_s24 = smul.u32 13, %s2855_s22 }
  0x13   : > { %s2176_s26 = smul.u32 80, %s2853_s14 }
  0x14   : > { %s244_s25 = sadd.s32 %s2174_s23, %s2173_s24  ;;  %s2175_s28 = smul.u32 10, %s2857_s13 }
  0x15   : > { %s1822_s27 = sshll.u32 %s244_s25, 2  ;;  %271 = sbr.rel (%p1824_p9) target bundleno = 32 (0x20), region = 36 }
  0x16   : > { %s2389_s4 = scalar_lea.vmem %s2832_s0, %s1822_s27  ;;  %s264_s5 = sadd.s32 %s2176_s26, %s2175_s28 }
  0x17   : > { %s1823_s6 = sshll.u32 %s264_s5, 3 }
  0x18   : > { %s2394_s9 = scalar_lea.vmem %s2835_s3, %s1823_s6 }
  0x1a   : > { %v1825_v0 = vld [vmem:[%s2834_s2] ss:$0 sm:$0xff] }
  0x1b   : > { %279 = vst [vmem:[%s2394_s9] sm:$0xff] %v1825_v0  ;;  %280 = vst [vmem:[%s2394_s9 + $0x8] sm:$0xff] %v1825_v0 }
  0x1c   : > { %281 = vst [vmem:[%s2394_s9 + $0x10] sm:$0xff] %v1825_v0  ;;  %282 = vst [vmem:[%s2394_s9 + $0x18] sm:$0xff] %v1825_v0 }
  0x1d   : > { %283 = vst [vmem:[%s2394_s9 + $0x20] sm:$0xff] %v1825_v0  ;;  %284 = vst [vmem:[%s2394_s9 + $0x28] sm:$0xff] %v1825_v0 }
  0x1e   : > { %285 = vst [vmem:[%s2394_s9 + $0x30] sm:$0xff] %v1825_v0  ;;  %286 = vst [vmem:[%s2394_s9 + $0x38] sm:$0xff] %v1825_v0 }
  0x1f   : > { %287 = vst [vmem:[%s2394_s9 + $0x40] sm:$0xff] %v1825_v0  ;;  %288 = vst [vmem:[%s2394_s9 + $0x48] sm:$0xff] %v1825_v0 }
  0x20 PF: > { %s1918_s13 = smul.u32 18, %s2293_s12  ;;  %v2319_v1 = vmov 0.0   ;;  %vm354_vm0 = vcmask 1041408   ;;  %vm2320_vm1 = vmmov 0   ;;  %v2235_v6 = vld [vmem:[%s2389_s4] sm:$0xff]   ;;  %v2236_v7 = vld [vmem:[%s2389_s4 + $0x18] sm:$0xff]  }
  0x21   : > { %1973 = vmatprep.subr.bf16.mxu0 %v2319_v1  ;;  %2171 = vmatprep.subr.bf16.mxu1 %v2319_v1  ;;  %vm338_vm2 = vcmask 31744   ;;  %v441_v10 = vld [vmem:[%s2389_s4] sm:$0xf]  ;;  %v442_v11 = vld [vmem:[%s2389_s4 + $0x4] sm:$0xf]  ;;  %v2439_v13 = vld [vmem:[%s2389_s4 + $0x8] sm:$0xff]  }
  0x22   : > { %s2416_s23 = scalar_lea.vmem %s2833_s1, %s1918_s13  ;;  %1975 = vmatprep.mubr.msk.bf16.mxu0 %vm2320_vm1, %v2319_v1  ;;  %1987 = vmatprep.mubr.msk.bf16.mxu1 %vm2320_vm1, %v2319_v1  ;;  %v1839_v12 = vcombine.low %v441_v10, %v442_v11  ;;  %v2237_v15 = vld [vmem:[%s2389_s4 + $0x8] sm:$0xff]   ;;  %v2238_v16 = vld [vmem:[%s2389_s4 + $0x20] sm:$0xff]   ;;  %v493_v19 = vshll.u32 %v2439_v13, 16  ;;  %v2242_v22 = vld [vmem:[%s2389_s4 + $0x10] sm:$0xff]   ;;  %vm484_vm3 = vsmask.f32 7424 }
  0x23   : > { %v312_v2 = vld [vmem:[%s2416_s23] sm:$0x3]  ;;  %v1851_v3 = vld [vmem:[%s2416_s23 + $0x4] sm:$0x3]  ;;  %v1838_v4 = vld [vmem:[%s2416_s23 + $0x2] sm:$0x3] }
  0x24   : > { %v356_v5 = vsel %vm354_vm0, %v312_v2, 0  ;;  %v666_v8 = vsel %vm354_vm0, %v1851_v3, 0  ;;  %v545_v9 = vsel %vm354_vm0, %v1838_v4, 0  ;;  %v488_v14 = vshll.u32 %v1839_v12, 16  ;;  %v630_v23 = vld [vmem:[%s2389_s4] sm:$0xe] }
  0x25   : > { %1974 = vmatpush3.bf16.msra.mxu0 %v356_v5  ;;  %2172 = vmatpush3.bf16.msra.mxu1 %v356_v5  ;;  %v486_v17 = vshrl.u32 %v1839_v12, 16  ;;  %v495_v21 = vrot.slane %v493_v19, 1  ;;  %v2239_v24 = vld [vmem:[%s2389_s4 + $0x10] sm:$0xff]   ;;  %v1859_v25 = vld [vmem:[%s2416_s23 + $0x6] sm:$0x3]  ;;  %v497_v28 = vshrl.u32 %v2439_v13, 16  ;;  %v1852_v30 = vcombine.low %v630_v23, %v442_v11 }
  0x26   : > { %2017 = vmatprep.subr.bf16.mxu0 %v2319_v1  ;;  %1995 = vmatprep.subr.bf16.mxu1 %v2319_v1  ;;  %v490_v18 = vrot.slane %v488_v14, 1  ;;  %v1888_v26 = vld [vmem:[%s2416_s23 + $0xc] sm:$0x3]  ;;  %v501_v29 = vshll.u32 %v2242_v22, 16  ;;  %v821_v31 = vsel %vm354_vm0, %v1859_v25, 0  ;;  %v640_v36 = vrot.slane %v2439_v13, 1 }
  0x27   : > { %v2463_v32 = vsel %vm354_vm0, %v1888_v26, 0  ;;  %v499_v33 = vor.u32 %v497_v28, %v495_v21  ;;  %v639_v35 = vrot.slane %v1852_v30, 1  ;;  %v2244_v37 = vld [vmem:[%s2389_s4 + $0x18] sm:$0xff]   ;;  %vm638_vm4 = vcmask 1046528   ;;  %v1872_v38 = vld [vmem:[%s2416_s23 + $0x8] sm:$0x3] }
  0x28   : > { %1976 = vmatmul.mubr.msk.bf16.vlgmr.msra.gmra.mxu0 %vm338_vm2, %v2235_v6  ;;  %1988 = vmatmul.mubr.msk.bf16.vlgmr.msra.gmra.mxu1 %vm338_vm2, %v2236_v7  ;;  %v491_v20 = vor.u32 %v490_v18, %v486_v17  ;;  %v503_v34 = vrot.slane %v501_v29, 1  ;;  %v505_v41 = vshrl.u32 %v2242_v22, 16  ;;  %v509_v42 = vshll.u32 %v2244_v37, 16  ;;  %v1901_v43 = vld [vmem:[%s2416_s23 + $0xe] sm:$0x3]  ;;  %v2245_v50 = vld [vmem:[%s2389_s4 + $0x20] sm:$0xff]  }
  0x29   : > { %2018 = vmatpush3.bf16.msra.mxu0 %v666_v8  ;;  %1979 = vmatprep.mubr.msk.bf16.mxu0 %vm2320_vm1, %v2319_v1  ;;  %v641_v40 = vsel %vm638_vm4, %v639_v35, %v640_v36  ;;  %v984_v44 = vsel %vm354_vm0, %v1872_v38, 0  ;;  %v642_v45 = vrot.slane %v2242_v22, 1  ;;  %v2482_v46 = vsel %vm354_vm0, %v1901_v43, 0  ;;  %v1909_v47 = vld [vmem:[%s2416_s23 + $0x10] sm:$0x3] }
  0x2a   : > { %1991 = vmatprep.mubr.msk.bf16.mxu1 %vm2320_vm1, %v2319_v1  ;;  %1996 = vmatpush3.bf16.msra.mxu1 %v545_v9  ;;  %v496_v27 = vsel %vm484_vm3, %v491_v20, %v495_v21  ;;  %v504_v39 = vsel %vm484_vm3, %v499_v33, %v503_v34  ;;  %v507_v48 = vor.u32 %v505_v41, %v503_v34  ;;  %v511_v49 = vrot.slane %v509_v42, 1  ;;  %v2246_v59 = vld [vmem:[%s2389_s4 + $0x28] ss:$0 sps:$4 sm:$0x11]   ;;  %v751_v4 = vld [vmem:[%s2389_s4 + $0x4] sm:$0xe] }
  0x2b   : > { %2039 = vmatprep.subr.bf16.mxu1 %v2319_v1  ;;  %2061 = vmatprep.subr.bf16.mxu0 %v2319_v1  ;;  %v2492_v51 = vsel %vm354_vm0, %v1909_v47, 0  ;;  %v643_v53 = vsel %vm638_vm4, %v640_v36, %v642_v45  ;;  %v513_v54 = vshrl.u32 %v2244_v37, 16  ;;  %v517_v55 = vshll.u32 %v2245_v50, 16  ;;  %v2513_v5 = vld [vmem:[%s2389_s4 + $0x8] sm:$0xf]  ;;  %v2517_v7 = vld [vmem:[%s2389_s4 + $0xc] sm:$0xff]  }
  0x2c   : > { %v512_v52 = vsel %vm484_vm3, %v507_v48, %v511_v49  ;;  %v644_v58 = vrot.slane %v2244_v37, 1  ;;  %v521_v62 = vshrl.u32 %v2245_v50, 16  ;;  %v525_v63 = vshll.u32 %v2246_v59, 16  ;;  %v1880_v19 = vld [vmem:[%s2416_s23 + $0xa] sm:$0x3]  ;;  %v2534_v20 = vld [vmem:[%s2389_s4 + $0x14] sm:$0xff]  }
  0x2d   : > { %v515_v56 = vor.u32 %v513_v54, %v511_v49  ;;  %v519_v57 = vrot.slane %v517_v55, 1  ;;  %v646_v3 = vrot.slane %v2245_v50, 1  ;;  %v1860_v6 = vcombine.low %v751_v4, %v2513_v5  ;;  %v2550_v34 = vld [vmem:[%s2389_s4 + $0x1c] sm:$0xff]   ;;  %v2566_v42 = vld [vmem:[%s2389_s4 + $0x24] sm:$0xff]  }
  0x2e   : > { %v645_v61 = vsel %vm638_vm4, %v642_v45, %v644_v58  ;;  %v527_v2 = vrot.slane %v525_v63, 1  ;;  %v648_v10 = vrot.slane %v2246_v59, 1  ;;  %v795_v12 = vrot.slane %v2517_v7, 1  ;;  %v2252_v50 = vld [vmem:[%s2389_s4 + $0x2c] ss:$0 sps:$4 sm:$0x11]  }
  0x2f   : > { %v520_v60 = vsel %vm484_vm3, %v515_v56, %v519_v57  ;;  %v523_v0 = vor.u32 %v521_v62, %v519_v57  ;;  %v647_v9 = vsel %vm638_vm4, %v644_v58, %v646_v3  ;;  %v794_v11 = vrot.slane %v1860_v6, 1  ;;  %v2581_v56 = vld [vmem:[%s2389_s4 + $0x2c] ss:$0 sps:$4 sm:$0x33]  }
  0x30   : > { %1980 = vmatmul.mubr.msk.bf16.gmra.mxu0 %vm338_vm2, %v2237_v15  ;;  %1992 = vmatmul.mubr.msk.bf16.gmra.mxu1 %vm338_vm2, %v2238_v16  ;;  %v916_v13 = vshrl.u32 %v1860_v6, 16  ;;  %v919_v14 = vshll.u32 %v1860_v6, 16  ;;  %v924_v15 = vshrl.u32 %v2517_v7, 16  ;;  %v927_v16 = vshll.u32 %v2517_v7, 16 }
  0x31   : > { %1983 = vmatprep.mubr.msk.bf16.mxu0 %vm2320_vm1, %v2319_v1  ;;  %1997 = vmatprep.mubr.msk.bf16.mxu1 %vm2320_vm1, %v2319_v1  ;;  %v528_v8 = vsel %vm484_vm3, %v523_v0, %v527_v2  ;;  %v649_v17 = vsel %vm638_vm4, %v646_v3, %v648_v10  ;;  %v796_v18 = vsel %vm638_vm4, %v794_v11, %v795_v12  ;;  %v1105_v25 = vsel %vm354_vm0, %v1880_v19, 0 }
  0x32   : > { %v918_v21 = vrot.slane %v916_v13, 1  ;;  %v921_v22 = vrot.slane %v919_v14, 2  ;;  %v926_v23 = vrot.slane %v924_v15, 1  ;;  %v797_v26 = vrot.slane %v2534_v20, 1  ;;  %v2610_v13 = vld [vmem:[%s2389_s4 + $0x10] sm:$0xff]  }
  0x33   : > { %v933_v29 = vshrl.u32 %v2534_v20, 16  ;;  %v936_v30 = vshll.u32 %v2534_v20, 16  ;;  %vm914_vm5 = vsmask.f32 6400  ;;  %v799_v37 = vrot.slane %v2550_v34, 1 }
  0x34   : > { %v801_v45 = vrot.slane %v2566_v42, 1  ;;  %v951_v48 = vshrl.u32 %v2566_v42, 16  ;;  %v954_v49 = vshll.u32 %v2566_v42, 16  ;;  %v803_v57 = vrot.slane %v2252_v50, 1 }
  0x35   : > { %v935_v35 = vrot.slane %v933_v29, 1  ;;  %v938_v36 = vrot.slane %v936_v30, 2  ;;  %v800_v41 = vsel %vm638_vm4, %v797_v26, %v799_v37  ;;  %v960_v59 = vshrl.u32 %v2581_v56, 16 }
  0x36   : > { %v953_v54 = vrot.slane %v951_v48, 1  ;;  %v956_v55 = vrot.slane %v954_v49, 2  ;;  %v804_v63 = vsel %vm638_vm4, %v801_v45, %v803_v57  ;;  %vm1077_vm6 = vcmask 1045504  }
  0x37   : > { %v939_v38 = vor.u32 %v938_v36, %v935_v35  ;;  %v962_v2 = vrot.slane %v960_v59, 1  ;;  %v1234_v15 = vrot.slane %v2610_v13, 2  ;;  %v1083_v19 = vrot.slane %v2550_v34, 2  ;;  %v2260_v36 = vld [vmem:[%s2389_s4 + $0x30] ss:$0 sps:$4 sm:$0x33]  }
  0x38   : > { %1984 = vmatmul.mubr.msk.bf16.gmra.mxu0 %vm338_vm2, %v2239_v24  ;;  %1998 = vmatmul.mubr.msk.bf16.vlgmr.msra.gmra.mxu1 %vm338_vm2, %v496_v27  ;;  %v929_v24 = vrot.slane %v927_v16, 2  ;;  %v922_v27 = vor.u32 %v921_v22, %v918_v21  ;;  %v957_v58 = vor.u32 %v956_v55, %v953_v54  ;;  %v2638_v22 = vld [vmem:[%s2389_s4 + $0x20] sm:$0xff]   ;;  %vm1353_vm7 = vsmask.f32 5376 }
  0x39   : > { %2001 = vmatprep.mubr.msk.bf16.mxu1 %vm2320_vm1, %v2319_v1  ;;  %2019 = vmatprep.mubr.msk.bf16.mxu0 %vm2320_vm1, %v2319_v1  ;;  %v1518_v55 = vrot.slane %v2610_v13, 3  ;;  %v1384_v57 = vshll.u32 %v2638_v22, 16  ;;  %vm1516_vm8 = vcmask 1044480  }
  0x3a   : > { %2040 = vmatpush3.bf16.msra.mxu1 %v821_v31  ;;  %v930_v28 = vor.u32 %v929_v24, %v926_v23  ;;  %v798_v31 = vsel %vm638_vm4, %v795_v12, %v797_v26  ;;  %v1238_v23 = vrot.slane %v2638_v22, 2  ;;  %v2649_v24 = vld [vmem:[%s2389_s4 + $0x28] sm:$0xff]  }
  0x3b   : > { %2083 = vmatprep.subr.bf16.mxu1 %v2319_v1 }
  0x3c   : > { %v931_v33 = vsel %vm914_vm5, %v922_v27, %v930_v28  ;;  %v1087_v27 = vrot.slane %v2581_v56, 2 }
  0x40   : > { %2002 = vmatmul.mubr.msk.bf16.gmra.mxu1 %vm338_vm2, %v504_v39  ;;  %2020 = vmatmul.mubr.msk.bf16.vlgmr.msra.gmra.mxu0 %vm338_vm2, %v641_v40  ;;  %v942_v39 = vshrl.u32 %v2550_v34, 16  ;;  %v945_v40 = vshll.u32 %v2550_v34, 16 }
  0x41   : > { %2062 = vmatpush3.bf16.msra.mxu0 %v984_v44  ;;  %2005 = vmatprep.mubr.msk.bf16.mxu1 %vm2320_vm1, %v2319_v1 }
  0x42   : > { %2023 = vmatprep.mubr.msk.bf16.mxu0 %vm2320_vm1, %v2319_v1  ;;  %2105 = vmatprep.subr.bf16.mxu0 %v2319_v1  ;;  %v944_v43 = vrot.slane %v942_v39, 1  ;;  %v947_v44 = vrot.slane %v945_v40, 2 }
  0x44   : > { %v948_v47 = vor.u32 %v947_v44, %v944_v43 }
  0x46   : > { %v958_v0 = vsel %vm914_vm5, %v948_v47, %v957_v58 }
  0x48   : > { %2006 = vmatmul.mubr.msk.bf16.gmra.mxu1 %vm338_vm2, %v512_v52  ;;  %2024 = vmatmul.mubr.msk.bf16.gmra.mxu0 %vm338_vm2, %v643_v53  ;;  %v802_v52 = vsel %vm638_vm4, %v799_v37, %v801_v45  ;;  %v949_v53 = vsel %vm914_vm5, %v939_v38, %v948_v47  ;;  %v1508_v45 = vld [vmem:[%s2389_s4 + $0x8] sm:$0x8] }
  0x49   : > { %2009 = vmatprep.mubr.msk.bf16.mxu1 %vm2320_vm1, %v2319_v1  ;;  %2027 = vmatprep.mubr.msk.bf16.mxu0 %vm2320_vm1, %v2319_v1 }
  0x50   : > { %2010 = vmatmul.mubr.msk.bf16.gmra.mxu1 %vm338_vm2, %v520_v60  ;;  %2028 = vmatmul.mubr.msk.bf16.gmra.mxu0 %vm338_vm2, %v645_v61  ;;  %v963_v60 = vshll.u32 %v2581_v56, 16  ;;  %v1069_v61 = vld [vmem:[%s2389_s4 + $0x4] sm:$0xc]  ;;  %v1381_v56 = vshrl.u32 %v2638_v22, 16 }
  0x51   : > { %2013 = vmatprep.mubr.msk.bf16.mxu1 %vm2320_vm1, %v2319_v1  ;;  %2031 = vmatprep.mubr.msk.bf16.mxu0 %vm2320_vm1, %v2319_v1  ;;  %v1881_v62 = vcombine.low %v1069_v61, %v2513_v5  ;;  %v1079_v5 = vrot.slane %v2517_v7, 2  ;;  %v1081_v7 = vrot.slane %v2534_v20, 2  ;;  %v1386_v61 = vrot.slane %v1384_v57, 3 }
  0x52   : > { %v965_v3 = vrot.slane %v963_v60, 2  ;;  %v1383_v60 = vrot.slane %v1381_v56, 2 }
  0x53   : > { %v1078_v6 = vrot.slane %v1881_v62, 2  ;;  %v1082_v16 = vsel %vm1077_vm6, %v1079_v5, %v1081_v7  ;;  %v1084_v20 = vsel %vm1077_vm6, %v1081_v7, %v1083_v19 }
  0x54   : > { %v966_v4 = vor.u32 %v965_v3, %v962_v2  ;;  %v1387_v62 = vor.u32 %v1386_v61, %v1383_v60  ;;  %v1393_v2 = vshll.u32 %v2649_v24, 16  ;;  %v293_v61 = vld [vmem:[%s2394_s9 + $0x20] sm:$0xff] }
  0x55   : > { %v1080_v11 = vsel %vm1077_vm6, %v1078_v6, %v1079_v5 }
  0x56   : > { %v967_v10 = vsel %vm914_vm5, %v957_v58, %v966_v4  ;;  %v1395_v5 = vrot.slane %v1393_v2, 3 }
  0x58   : > { %2014 = vmatmul.mubr.msk.bf16.gmra.mxu1 %vm338_vm2, %v528_v8  ;;  %2032 = vmatmul.mubr.msk.bf16.gmra.mxu0 %vm338_vm2, %v647_v9  ;;  %v1190_v8 = vld [vmem:[%s2389_s4 + $0x8] sm:$0xc]  ;;  %v2604_v9 = vld [vmem:[%s2389_s4 + $0xc] sm:$0xf] }
  0x59   : > { %2035 = vmatprep.mubr.msk.bf16.mxu0 %vm2320_vm1, %v2319_v1  ;;  %2041 = vmatprep.mubr.msk.bf16.mxu1 %vm2320_vm1, %v2319_v1  ;;  %v1889_v12 = vcombine.low %v1190_v8, %v2604_v9  ;;  %v1910_v47 = vcombine.low %v1508_v45, %v2604_v9  ;;  %v2262_v8 = vld [vmem:[%s2389_s4 + $0x30] ss:$0 sps:$4 sm:$0x77]  }
  0x5b   : > { %v1233_v14 = vrot.slane %v1889_v12, 2  ;;  %v1355_v29 = vshrl.u32 %v1889_v12, 16  ;;  %v1358_v30 = vshll.u32 %v1889_v12, 16  ;;  %v1402_v12 = vshll.u32 %v2262_v8, 16 }
  0x5d   : > { %v1357_v37 = vrot.slane %v1355_v29, 2 }
  0x60   : > { %2036 = vmatmul.mubr.msk.bf16.gmra.mxu0 %vm338_vm2, %v649_v17  ;;  %2042 = vmatmul.mubr.msk.bf16.vlgmr.msra.gmra.mxu1 %vm338_vm2, %v796_v18  ;;  %v1235_v17 = vsel %vm1077_vm6, %v1233_v14, %v1234_v15  ;;  %v2624_v18 = vld [vmem:[%s2389_s4 + $0x18] sm:$0xff]  }
  0x61   : > { %2045 = vmatprep.mubr.msk.bf16.mxu1 %vm2320_vm1, %v2319_v1  ;;  %2063 = vmatprep.mubr.msk.bf16.mxu0 %vm2320_vm1, %v2319_v1  ;;  %v1372_v43 = vshrl.u32 %v2624_v18, 16  ;;  %v1375_v44 = vshll.u32 %v2624_v18, 16 }
  0x62   : > { %2084 = vmatpush3.bf16.msra.mxu1 %v1105_v25 }
  0x63   : > { %2127 = vmatprep.subr.bf16.mxu1 %v2319_v1  ;;  %v1374_v50 = vrot.slane %v1372_v43, 2 }
  0x68   : > { %2046 = vmatmul.mubr.msk.bf16.gmra.mxu1 %vm338_vm2, %v798_v31  ;;  %2064 = vmatmul.mubr.msk.bf16.vlgmr.msra.gmra.mxu0 %vm338_vm2, %v931_v33  ;;  %v1363_v31 = vshrl.u32 %v2610_v13, 16  ;;  %v1366_v33 = vshll.u32 %v2610_v13, 16 }
  0x69   : > { %2106 = vmatpush3.bf16.msra.mxu0 %v2463_v32  ;;  %2049 = vmatprep.mubr.msk.bf16.mxu1 %vm2320_vm1, %v2319_v1  ;;  %v940_v32 = vsel %vm914_vm5, %v930_v28, %v939_v38  ;;  %v1240_v28 = vrot.slane %v2649_v24, 2  ;;  %v1360_v38 = vrot.slane %v1358_v30, 3 }
  0x6a   : > { %2067 = vmatprep.mubr.msk.bf16.mxu0 %vm2320_vm1, %v2319_v1  ;;  %2149 = vmatprep.subr.bf16.mxu0 %v2319_v1  ;;  %v1365_v39 = vrot.slane %v1363_v31, 2  ;;  %v1368_v40 = vrot.slane %v1366_v33, 3  ;;  %v289_v31 = vld [vmem:[%s2394_s9] sm:$0xff] }
  0x6b   : > { %v1241_v35 = vsel %vm1077_vm6, %v1238_v23, %v1240_v28 }
  0x70   : > { %2050 = vmatmul.mubr.msk.bf16.gmra.mxu1 %vm338_vm2, %v800_v41  ;;  %2068 = vmatmul.mubr.msk.bf16.gmra.mxu0 %vm338_vm2, %v940_v32  ;;  %v1242_v41 = vrot.slane %v2260_v36, 2  ;;  %v1361_v32 = vor.u32 %v1360_v38, %v1357_v37  ;;  %v290_v38 = vld [vmem:[%s2394_s9 + $0x8] sm:$0xff] }
  0x71   : > { %2053 = vmatprep.mubr.msk.bf16.mxu1 %vm2320_vm1, %v2319_v1  ;;  %2071 = vmatprep.mubr.msk.bf16.mxu0 %vm2320_vm1, %v2319_v1 }
  0x72   : > { %v1243_v48 = vsel %vm1077_vm6, %v1240_v28, %v1242_v41 }
  0x78   : > { %2054 = vmatmul.mubr.msk.bf16.gmra.mxu1 %vm338_vm2, %v802_v52  ;;  %2072 = vmatmul.mubr.msk.bf16.gmra.mxu0 %vm338_vm2, %v949_v53  ;;  %v1377_v52 = vrot.slane %v1375_v44, 3  ;;  %v1517_v53 = vrot.slane %v1910_v47, 3  ;;  %v291_v44 = vld [vmem:[%s2394_s9 + $0x10] sm:$0xff] }
  0x79   : > { %2057 = vmatprep.mubr.msk.bf16.mxu1 %vm2320_vm1, %v2319_v1  ;;  %2075 = vmatprep.mubr.msk.bf16.mxu0 %vm2320_vm1, %v2319_v1 }
  0x7a   : > { %v1378_v54 = vor.u32 %v1377_v52, %v1374_v50  ;;  %v1519_v59 = vsel %vm1516_vm8, %v1517_v53, %v1518_v55  ;;  %v292_v53 = vld [vmem:[%s2394_s9 + $0x18] sm:$0xff] }
  0x7c   : > { %v1388_v3 = vsel %vm1353_vm7, %v1378_v54, %v1387_v62 }
  0x80   : > { %2058 = vmatmul.mubr.msk.bf16.gmra.mxu1 %vm338_vm2, %v804_v63  ;;  %2076 = vmatmul.mubr.msk.bf16.gmra.mxu0 %vm338_vm2, %v958_v0  ;;  %v1520_v63 = vrot.slane %v2624_v18, 3  ;;  %v1390_v0 = vshrl.u32 %v2649_v24, 16 }
  0x81   : > { %2079 = vmatprep.mubr.msk.bf16.mxu0 %vm2320_vm1, %v2319_v1  ;;  %2085 = vmatprep.mubr.msk.bf16.mxu1 %vm2320_vm1, %v2319_v1 }
  0x82   : > { %v1521_v4 = vsel %vm1516_vm8, %v1518_v55, %v1520_v63  ;;  %v1392_v6 = vrot.slane %v1390_v0, 2 }
  0x84   : > { %v1396_v9 = vor.u32 %v1395_v5, %v1392_v6  ;;  %v294_v5 = vld [vmem:[%s2394_s9 + $0x28] sm:$0xff] }
  0x86   : > { %v1397_v13 = vsel %vm1353_vm7, %v1387_v62, %v1396_v9 }
  0x88   : > { %2080 = vmatmul.mubr.msk.bf16.gmra.mxu0 %vm338_vm2, %v967_v10  ;;  %2086 = vmatmul.mubr.msk.bf16.vlgmr.msra.gmra.mxu1 %vm338_vm2, %v1080_v11  ;;  %v1522_v10 = vrot.slane %v2638_v22, 3  ;;  %v1399_v11 = vshrl.u32 %v2262_v8, 16 }
  0x89   : > { %2089 = vmatprep.mubr.msk.bf16.mxu1 %vm2320_vm1, %v2319_v1  ;;  %2107 = vmatprep.mubr.msk.bf16.mxu0 %vm2320_vm1, %v2319_v1 }
  0x8a   : > { %2128 = vmatpush3.bf16.msra.mxu1 %v2482_v46  ;;  %v1236_v46 = vrot.slane %v2624_v18, 2  ;;  %v1523_v7 = vsel %vm1516_vm8, %v1520_v63, %v1522_v10  ;;  %v1401_v14 = vrot.slane %v1399_v11, 2 }
  0x8c   : > { %v1237_v21 = vsel %vm1077_vm6, %v1234_v15, %v1236_v46  ;;  %v1239_v26 = vsel %vm1077_vm6, %v1236_v46, %v1238_v23  ;;  %v1404_v15 = vrot.slane %v1402_v12, 3  ;;  %v1526_v46 = vrot.slane %v2262_v8, 3 }
  0x90   : > { %2090 = vmatmul.mubr.msk.bf16.gmra.mxu1 %vm338_vm2, %v1082_v16  ;;  %2108 = vmatmul.mubr.msk.bf16.vlgmr.msra.gmra.mxu0 %vm338_vm2, %v1235_v17  ;;  %v1405_v16 = vor.u32 %v1404_v15, %v1401_v14  ;;  %v1524_v17 = vrot.slane %v2649_v24, 3  ;;  %v295_v14 = vld [vmem:[%s2394_s9 + $0x30] sm:$0xff] }
  0x91   : > { %2150 = vmatpush3.bf16.msra.mxu0 %v2492_v51  ;;  %2093 = vmatprep.mubr.msk.bf16.mxu1 %vm2320_vm1, %v2319_v1  ;;  %v1085_v51 = vrot.slane %v2566_v42, 2  ;;  %v1369_v42 = vor.u32 %v1368_v40, %v1365_v39 }
  0x92   : > { %2111 = vmatprep.mubr.msk.bf16.mxu0 %vm2320_vm1, %v2319_v1  ;;  %v1406_v18 = vsel %vm1353_vm7, %v1396_v9, %v1405_v16 }
  0x93   : > { %v1086_v25 = vsel %vm1077_vm6, %v1083_v19, %v1085_v51  ;;  %v1088_v34 = vsel %vm1077_vm6, %v1085_v51, %v1087_v27  ;;  %v1370_v49 = vsel %vm1353_vm7, %v1361_v32, %v1369_v42  ;;  %v1379_v58 = vsel %vm1353_vm7, %v1369_v42, %v1378_v54 }
  0x94   : > { %v1525_v19 = vsel %vm1516_vm8, %v1522_v10, %v1524_v17 }
  0x98   : > { %2094 = vmatmul.mubr.msk.bf16.gmra.mxu1 %vm338_vm2, %v1084_v20  ;;  %2112 = vmatmul.mubr.msk.bf16.gmra.mxu0 %vm338_vm2, %v1237_v21  ;;  %v1527_v20 = vsel %vm1516_vm8, %v1524_v17, %v1526_v46 }
  0x99   : > { %2097 = vmatprep.mubr.msk.bf16.mxu1 %vm2320_vm1, %v2319_v1  ;;  %2115 = vmatprep.mubr.msk.bf16.mxu0 %vm2320_vm1, %v2319_v1 }
  0xa0   : > { %2098 = vmatmul.mubr.msk.bf16.gmra.mxu1 %vm338_vm2, %v1086_v25  ;;  %2116 = vmatmul.mubr.msk.bf16.gmra.mxu0 %vm338_vm2, %v1239_v26 }
  0xa1   : > { %2101 = vmatprep.mubr.msk.bf16.mxu1 %vm2320_vm1, %v2319_v1  ;;  %2119 = vmatprep.mubr.msk.bf16.mxu0 %vm2320_vm1, %v2319_v1 }
  0xa8   : > { %2102 = vmatmul.mubr.msk.bf16.gmra.mxu1 %vm338_vm2, %v1088_v34  ;;  %2120 = vmatmul.mubr.msk.bf16.gmra.mxu0 %vm338_vm2, %v1241_v35 }
  0xa9   : > { %2123 = vmatprep.mubr.msk.bf16.mxu0 %vm2320_vm1, %v2319_v1  ;;  %2129 = vmatprep.mubr.msk.bf16.mxu1 %vm2320_vm1, %v2319_v1 }
  0xb0   : > { %2124 = vmatmul.mubr.msk.bf16.gmra.mxu0 %vm338_vm2, %v1243_v48  ;;  %2130 = vmatmul.mubr.msk.bf16.vlgmr.msra.gmra.mxu1 %vm338_vm2, %v1370_v49 }
  0xb1   : > { %2133 = vmatprep.mubr.msk.bf16.mxu1 %vm2320_vm1, %v2319_v1  ;;  %2151 = vmatprep.mubr.msk.bf16.mxu0 %vm2320_vm1, %v2319_v1 }
  0xb8   : > { %2134 = vmatmul.mubr.msk.bf16.gmra.mxu1 %vm338_vm2, %v1379_v58  ;;  %2152 = vmatmul.mubr.msk.bf16.vlgmr.msra.gmra.mxu0 %vm338_vm2, %v1519_v59 }
  0xb9   : > { %2137 = vmatprep.mubr.msk.bf16.mxu1 %vm2320_vm1, %v2319_v1  ;;  %2155 = vmatprep.mubr.msk.bf16.mxu0 %vm2320_vm1, %v2319_v1 }
  0xc0   : > { %2138 = vmatmul.mubr.msk.bf16.gmra.mxu1 %vm338_vm2, %v1388_v3  ;;  %2156 = vmatmul.mubr.msk.bf16.gmra.mxu0 %vm338_vm2, %v1521_v4 }
  0xc1   : > { %2141 = vmatprep.mubr.msk.bf16.mxu1 %vm2320_vm1, %v2319_v1  ;;  %2159 = vmatprep.mubr.msk.bf16.mxu0 %vm2320_vm1, %v2319_v1 }
  0xc8   : > { %2142 = vmatmul.mubr.msk.bf16.gmra.mxu1 %vm338_vm2, %v1397_v13  ;;  %2160 = vmatmul.mubr.msk.bf16.gmra.mxu0 %vm338_vm2, %v1523_v7 }
  0xc9   : > { %2145 = vmatprep.mubr.msk.bf16.mxu1 %vm2320_vm1, %v2319_v1  ;;  %2163 = vmatprep.mubr.msk.bf16.mxu0 %vm2320_vm1, %v2319_v1 }
  0xd0   : > { %2146 = vmatmul.mubr.msk.bf16.gmra.mxu1 %vm338_vm2, %v1406_v18  ;;  %2164 = vmatmul.mubr.msk.bf16.gmra.mxu0 %vm338_vm2, %v1525_v19 }
  0xd1   : > { %2167 = vmatprep.mubr.msk.bf16.mxu0 %vm2320_vm1, %v2319_v1 }
  0xd8   : > { %2168 = vmatmul.mubr.msk.bf16.gmra.mxu0 %vm338_vm2, %v1527_v20 }
  0xe8   : > { %v392_v21 = vpop.f32.mrf.mxu0  ;;  %v416_v22 = vpop.f32.mrf.mxu1 }
  0xe9   : > { %v431_v37 = vadd.f32 %v392_v21, %v289_v31  ;;  %v437_v20 = vadd.f32 %v416_v22, %v295_v14  ;;  %v296_v21 = vld [vmem:[%s2394_s9 + $0x38] sm:$0xff]  ;;  %v298_v22 = vld [vmem:[%s2394_s9 + $0x48] sm:$0xff] }
  0xea   : > { %v1977_v51 = vpop.f32.mrf.mxu0  ;;  %v1989_v23 = vpop.f32.mrf.mxu1 }
  0xec   : > { %v395_v24 = vpop.f32.mrf.mxu0  ;;  %v2725_v25 = vpop.f32.mrf.mxu1 }
  0xed   : > { %v432_v43 = vadd.f32 %v395_v24, %v290_v38 }
  0xee   : > { %v1978_v26 = vpop.f32.mrf.mxu0  ;;  %v1990_v27 = vpop.f32.mrf.mxu1 }
  0xf0   : > { %v400_v28 = vpop.f32.mrf.mxu0  ;;  %v2727_v29 = vpop.f32.mrf.mxu1 }
  0xf1   : > { %v433_v52 = vadd.f32 %v400_v28, %v291_v44 }
  0xf2   : > { %v1981_v1 = vpop.f32.mrf.mxu0  ;;  %v1993_v30 = vpop.f32.mrf.mxu1 }
  0xf3   : > { %v438_v1 = vadd.f32 %v2725_v25, %v296_v21  ;;  %v297_v30 = vld [vmem:[%s2394_s9 + $0x40] sm:$0xff] }
  0xf4   : > { %v403_v33 = vpop.f32.mrf.mxu0  ;;  %v2730_v34 = vpop.f32.mrf.mxu1 }
  0xf5   : > { %v434_v60 = vadd.f32 %v403_v33, %v292_v53 }
  0xf6   : > { %v1982_v35 = vpop.f32.mrf.mxu0  ;;  %v1994_v36 = vpop.f32.mrf.mxu1 }
  0xf8   : > { %v408_v39 = vpop.f32.mrf.mxu0  ;;  %v581_v40 = vpop.f32.mrf.mxu1 }
  0xf9   : > { %v620_v41 = vadd.f32 %v581_v40, %v431_v37  ;;  %v435_v6 = vadd.f32 %v408_v39, %v293_v61  ;;  %v439_v39 = vadd.f32 %v2727_v29, %v297_v30 }
  0xfa   : > { %v1985_v32 = vpop.f32.mrf.mxu0  ;;  %v1999_v42 = vpop.f32.mrf.mxu1 }
  0xfc   : > { %v411_v45 = vpop.f32.mrf.mxu0  ;;  %v584_v47 = vpop.f32.mrf.mxu1 }
  0xfd   : > { %v621_v48 = vadd.f32 %v584_v47, %v432_v43  ;;  %v436_v7 = vadd.f32 %v411_v45, %v294_v5  ;;  %v440_v45 = vadd.f32 %v2730_v34, %v298_v22 }
  0xfe   : > { %v1986_v49 = vpop.f32.mrf.mxu0  ;;  %v2000_v50 = vpop.f32.mrf.mxu1 }
 0x100   : > { %v589_v54 = vpop.f32.mrf.mxu1  ;;  %v702_v55 = vpop.f32.mrf.mxu0 }
 0x101   : > { %v622_v56 = vadd.f32 %v589_v54, %v433_v52  ;;  %v741_v57 = vadd.f32 %v702_v55, %v620_v41 }
 0x102   : > { %v2003_v58 = vpop.f32.mrf.mxu1  ;;  %v2021_v59 = vpop.f32.mrf.mxu0 }
 0x104   : > { %v592_v62 = vpop.f32.mrf.mxu1  ;;  %v705_v63 = vpop.f32.mrf.mxu0 }
 0x105   : > { %v623_v0 = vadd.f32 %v592_v62, %v434_v60  ;;  %v742_v2 = vadd.f32 %v705_v63, %v621_v48 }
 0x106   : > { %v2004_v3 = vpop.f32.mrf.mxu1  ;;  %v2022_v4 = vpop.f32.mrf.mxu0 }
 0x108   : > { %v597_v8 = vpop.f32.mrf.mxu1  ;;  %v710_v9 = vpop.f32.mrf.mxu0 }
 0x109   : > { %v624_v10 = vadd.f32 %v597_v8, %v435_v6  ;;  %v743_v11 = vadd.f32 %v710_v9, %v622_v56 }
 0x10a   : > { %v2007_v12 = vpop.f32.mrf.mxu1  ;;  %v2025_v13 = vpop.f32.mrf.mxu0 }
 0x10c   : > { %v600_v15 = vpop.f32.mrf.mxu1  ;;  %v713_v16 = vpop.f32.mrf.mxu0 }
 0x10d   : > { %v625_v17 = vadd.f32 %v600_v15, %v436_v7  ;;  %v744_v18 = vadd.f32 %v713_v16, %v623_v0 }
 0x10e   : > { %v2008_v19 = vpop.f32.mrf.mxu1  ;;  %v2026_v46 = vpop.f32.mrf.mxu0 }
 0x110   : > { %v605_v51 = vpop.f32.mrf.mxu1  ;;  %v718_v23 = vpop.f32.mrf.mxu0 }
 0x111   : > { %v626_v24 = vadd.f32 %v605_v51, %v437_v20  ;;  %v745_v26 = vadd.f32 %v718_v23, %v624_v10 }
 0x112   : > { %v2011_v27 = vpop.f32.mrf.mxu1  ;;  %v2029_v28 = vpop.f32.mrf.mxu0 }
 0x114   : > { %v608_v31 = vpop.f32.mrf.mxu1  ;;  %v721_v33 = vpop.f32.mrf.mxu0 }
 0x115   : > { %v627_v35 = vadd.f32 %v608_v31, %v438_v1  ;;  %v746_v36 = vadd.f32 %v721_v33, %v625_v17 }
 0x116   : > { %v2012_v37 = vpop.f32.mrf.mxu1  ;;  %v2030_v38 = vpop.f32.mrf.mxu0 }
 0x118   : > { %v613_v40 = vpop.f32.mrf.mxu1  ;;  %v726_v41 = vpop.f32.mrf.mxu0 }
 0x119   : > { %v628_v32 = vadd.f32 %v613_v40, %v439_v39  ;;  %v747_v42 = vadd.f32 %v726_v41, %v626_v24 }
 0x11a   : > { %v2015_v43 = vpop.f32.mrf.mxu1  ;;  %v2033_v44 = vpop.f32.mrf.mxu0 }
 0x11c   : > { %v616_v47 = vpop.f32.mrf.mxu1  ;;  %v729_v25 = vpop.f32.mrf.mxu0 }
 0x11d   : > { %v629_v48 = vadd.f32 %v616_v47, %v440_v45  ;;  %v748_v49 = vadd.f32 %v729_v25, %v627_v35 }
 0x11e   : > { %v2016_v50 = vpop.f32.mrf.mxu1  ;;  %v2034_v52 = vpop.f32.mrf.mxu0 }
 0x120   : > { %v734_v53 = vpop.f32.mrf.mxu0  ;;  %v857_v54 = vpop.f32.mrf.mxu1 }
 0x121   : > { %v749_v55 = vadd.f32 %v734_v53, %v628_v32  ;;  %v896_v56 = vadd.f32 %v857_v54, %v741_v57 }
 0x122   : > { %v2037_v29 = vpop.f32.mrf.mxu0  ;;  %v2043_v58 = vpop.f32.mrf.mxu1 }
 0x124   : > { %v737_v59 = vpop.f32.mrf.mxu0  ;;  %v860_v60 = vpop.f32.mrf.mxu1 }
 0x125   : > { %v750_v61 = vadd.f32 %v737_v59, %v629_v48  ;;  %v897_v62 = vadd.f32 %v860_v60, %v742_v2 }
 0x126   : > { %v2038_v63 = vpop.f32.mrf.mxu0  ;;  %v2044_v0 = vpop.f32.mrf.mxu1 }
 0x128   : > { %v865_v3 = vpop.f32.mrf.mxu1  ;;  %v1020_v34 = vpop.f32.mrf.mxu0 }
 0x129   : > { %v898_v4 = vadd.f32 %v865_v3, %v743_v11  ;;  %v2744_v6 = vadd.f32 %v1020_v34, %v896_v56 }
 0x12a   : > { %v2047_v5 = vpop.f32.mrf.mxu1  ;;  %v2065_v8 = vpop.f32.mrf.mxu0 }
 0x12c   : > { %v868_v9 = vpop.f32.mrf.mxu1  ;;  %v1023_v10 = vpop.f32.mrf.mxu0 }
 0x12d   : > { %v899_v12 = vadd.f32 %v868_v9, %v744_v18  ;;  %v2746_v13 = vadd.f32 %v1023_v10, %v897_v62 }
 0x12e   : > { %v2048_v57 = vpop.f32.mrf.mxu1  ;;  %v2066_v7 = vpop.f32.mrf.mxu0 }
 0x130   : > { %v873_v14 = vpop.f32.mrf.mxu1  ;;  %v1028_v15 = vpop.f32.mrf.mxu0 }
 0x131   : > { %v900_v16 = vadd.f32 %v873_v14, %v745_v26  ;;  %v2748_v2 = vadd.f32 %v1028_v15, %v898_v4 }
 0x132   : > { %v2051_v17 = vpop.f32.mrf.mxu1  ;;  %v2069_v19 = vpop.f32.mrf.mxu0 }
 0x134   : > { %v876_v46 = vpop.f32.mrf.mxu1  ;;  %v1031_v11 = vpop.f32.mrf.mxu0 }
 0x135   : > { %v901_v20 = vadd.f32 %v876_v46, %v746_v36  ;;  %v2750_v21 = vadd.f32 %v1031_v11, %v899_v12 }
 0x136   : > { %v2052_v51 = vpop.f32.mrf.mxu1  ;;  %v2070_v23 = vpop.f32.mrf.mxu0 }
 0x138   : > { %v881_v24 = vpop.f32.mrf.mxu1  ;;  %v1036_v18 = vpop.f32.mrf.mxu0 }
 0x139   : > { %v902_v27 = vadd.f32 %v881_v24, %v747_v42  ;;  %v2752_v28 = vadd.f32 %v1036_v18, %v900_v16 }
 0x13a   : > { %v2055_v1 = vpop.f32.mrf.mxu1  ;;  %v2073_v30 = vpop.f32.mrf.mxu0 }
 0x13c   : > { %v884_v31 = vpop.f32.mrf.mxu1  ;;  %v1039_v26 = vpop.f32.mrf.mxu0 }
 0x13d   : > { %v903_v33 = vadd.f32 %v884_v31, %v748_v49  ;;  %v2754_v35 = vadd.f32 %v1039_v26, %v901_v20 }
 0x13e   : > { %v2056_v37 = vpop.f32.mrf.mxu1  ;;  %v2074_v38 = vpop.f32.mrf.mxu0 }
 0x140   : > { %v889_v39 = vpop.f32.mrf.mxu1  ;;  %v1044_v36 = vpop.f32.mrf.mxu0 }
 0x141   : > { %v904_v22 = vadd.f32 %v889_v39, %v749_v55  ;;  %v2756_v40 = vadd.f32 %v1044_v36, %v902_v27 }
 0x142   : > { %v2059_v41 = vpop.f32.mrf.mxu1  ;;  %v2077_v32 = vpop.f32.mrf.mxu0 }
 0x144   : > { %v892_v43 = vpop.f32.mrf.mxu1  ;;  %v1047_v42 = vpop.f32.mrf.mxu0 }
 0x145   : > { %v905_v44 = vadd.f32 %v892_v43, %v750_v61  ;;  %v2758_v45 = vadd.f32 %v1047_v42, %v903_v33 }
 0x146   : > { %v2060_v47 = vpop.f32.mrf.mxu1  ;;  %v2078_v25 = vpop.f32.mrf.mxu0 }
 0x148   : > { %v1052_v48 = vpop.f32.mrf.mxu0  ;;  %v1141_v49 = vpop.f32.mrf.mxu1 }
 0x149   : > { %v2760_v50 = vadd.f32 %v1052_v48, %v904_v22  ;;  %v1180_v39 = vadd.f32 %v1141_v49, %v2744_v6 }
 0x14a   : > { %v2081_v52 = vpop.f32.mrf.mxu0  ;;  %v2087_v53 = vpop.f32.mrf.mxu1 }
 0x14c   : > { %v1055_v54 = vpop.f32.mrf.mxu0  ;;  %v1144_v56 = vpop.f32.mrf.mxu1 }
 0x14d   : > { %v2762_v55 = vadd.f32 %v1055_v54, %v905_v44  ;;  %v1181_v42 = vadd.f32 %v1144_v56, %v2746_v13 }
 0x14e   : > { %v2082_v29 = vpop.f32.mrf.mxu0  ;;  %v2088_v58 = vpop.f32.mrf.mxu1 }
 0x150   : > { %v1149_v59 = vpop.f32.mrf.mxu1  ;;  %v1296_v60 = vpop.f32.mrf.mxu0 }
 0x151   : > { %v1335_v41 = vadd.f32 %v1296_v60, %v1180_v39  ;;  %v1182_v29 = vadd.f32 %v1149_v59, %v2748_v2 }
 0x152   : > { %v2091_v62 = vpop.f32.mrf.mxu1  ;;  %v2109_v61 = vpop.f32.mrf.mxu0 }
 0x154   : > { %v1152_v63 = vpop.f32.mrf.mxu1  ;;  %v1299_v0 = vpop.f32.mrf.mxu0 }
 0x155   : > { %v1336_v48 = vadd.f32 %v1299_v0, %v1181_v42  ;;  %v1183_v13 = vadd.f32 %v1152_v63, %v2750_v21 }
 0x156   : > { %v2092_v3 = vpop.f32.mrf.mxu1  ;;  %v2110_v34 = vpop.f32.mrf.mxu0 }
 0x158   : > { %v1157_v4 = vpop.f32.mrf.mxu1  ;;  %v1304_v5 = vpop.f32.mrf.mxu0 }
 0x159   : > { %v1337_v60 = vadd.f32 %v1304_v5, %v1182_v29  ;;  %v1184_v59 = vadd.f32 %v1157_v4, %v2752_v28 }
 0x15a   : > { %v2095_v8 = vpop.f32.mrf.mxu1  ;;  %v2113_v9 = vpop.f32.mrf.mxu0 }
 0x15c   : > { %v2764_v10 = vpop.f32.mrf.mxu1  ;;  %v1307_v12 = vpop.f32.mrf.mxu0 }
 0x15d   : > { %v1338_v8 = vadd.f32 %v1307_v12, %v1183_v13  ;;  %v1185_v63 = vadd.f32 %v2764_v10, %v2754_v35 }
 0x15e   : > { %v2096_v57 = vpop.f32.mrf.mxu1  ;;  %v2114_v7 = vpop.f32.mrf.mxu0 }
 0x160   : > { %v2766_v14 = vpop.f32.mrf.mxu1  ;;  %v1312_v15 = vpop.f32.mrf.mxu0 }
 0x162   : > { %v2099_v16 = vpop.f32.mrf.mxu1  ;;  %v2117_v17 = vpop.f32.mrf.mxu0 }
 0x163   : > { %v1339_v17 = vadd.f32 %v1312_v15, %v1184_v59 }
 0x164   : > { %v2768_v19 = vpop.f32.mrf.mxu1  ;;  %v1315_v46 = vpop.f32.mrf.mxu0 }
 0x166   : > { %v2100_v11 = vpop.f32.mrf.mxu1  ;;  %v2118_v20 = vpop.f32.mrf.mxu0 }
 0x168   : > { %v2770_v51 = vpop.f32.mrf.mxu1  ;;  %v2772_v23 = vpop.f32.mrf.mxu0 }
 0x16a   : > { %v2103_v24 = vpop.f32.mrf.mxu1  ;;  %v2121_v18 = vpop.f32.mrf.mxu0 }
 0x16c   : > { %v2774_v27 = vpop.f32.mrf.mxu1  ;;  %v2776_v1 = vpop.f32.mrf.mxu0 }
 0x16e   : > { %v2104_v30 = vpop.f32.mrf.mxu1  ;;  %v2122_v31 = vpop.f32.mrf.mxu0 }
 0x16f   : > { %v1340_v30 = vadd.f32 %v1315_v46, %v1185_v63 }
 0x170   : > { %v2778_v26 = vpop.f32.mrf.mxu0  ;;  %v1459_v33 = vpop.f32.mrf.mxu1 }
 0x171   : > { %v1498_v44 = vadd.f32 %v1459_v33, %v1335_v41  ;;  %v1186_v33 = vadd.f32 %v2766_v14, %v2756_v40  ;;  %v1187_v41 = vadd.f32 %v2768_v19, %v2758_v45 }
 0x172   : > { %v2125_v37 = vpop.f32.mrf.mxu0  ;;  %v2131_v38 = vpop.f32.mrf.mxu1 }
 0x173   : > { %v1341_v39 = vadd.f32 %v2772_v23, %v1186_v33  ;;  %v1342_v40 = vadd.f32 %v2776_v1, %v1187_v41  ;;  %v1189_v1 = vadd.f32 %v2774_v27, %v2762_v55 }
 0x174   : > { %v2781_v36 = vpop.f32.mrf.mxu0  ;;  %v1462_v22 = vpop.f32.mrf.mxu1 }
 0x175   : > { %v1499_v6 = vadd.f32 %v1462_v22, %v1336_v48 }
 0x176   : > { %v2126_v32 = vpop.f32.mrf.mxu0  ;;  %v2132_v43 = vpop.f32.mrf.mxu1 }
 0x178   : > { %v1467_v47 = vpop.f32.mrf.mxu1  ;;  %v1580_v25 = vpop.f32.mrf.mxu0 }
 0x179   : > { %v1619_v52 = vadd.f32 %v1580_v25, %v1498_v44  ;;  %v1500_v56 = vadd.f32 %v1467_v47, %v1337_v60  ;;  %v1188_v47 = vadd.f32 %v2770_v51, %v2760_v50 }
 0x17a   : > { %v2135_v53 = vpop.f32.mrf.mxu1  ;;  %v2153_v54 = vpop.f32.mrf.mxu0 }
 0x17b   : > { %1629 = vst [vmem:[%s2394_s9] sm:$0xff] %v1619_v52  ;;  %v1343_v45 = vadd.f32 %v2778_v26, %v1188_v47 }
 0x17c   : > { %v1470_v49 = vpop.f32.mrf.mxu1  ;;  %v1583_v58 = vpop.f32.mrf.mxu0 }
 0x17d   : > { %v1620_v62 = vadd.f32 %v1583_v58, %v1499_v6  ;;  %v1501_v7 = vadd.f32 %v1470_v49, %v1338_v8  ;;  %v1344_v6 = vadd.f32 %v2781_v36, %v1189_v1 }
 0x17e   : > { %v2136_v61 = vpop.f32.mrf.mxu1  ;;  %v2154_v3 = vpop.f32.mrf.mxu0 }
 0x17f   : > { %1630 = vst [vmem:[%s2394_s9 + $0x8] sm:$0xff] %v1620_v62 }
 0x180   : > { %v1475_v34 = vpop.f32.mrf.mxu1  ;;  %v1588_v0 = vpop.f32.mrf.mxu0 }
 0x181   : > { %v1621_v9 = vadd.f32 %v1588_v0, %v1500_v56  ;;  %v1502_v24 = vadd.f32 %v1475_v34, %v1339_v17 }
 0x182   : > { %v2139_v57 = vpop.f32.mrf.mxu1  ;;  %v2157_v2 = vpop.f32.mrf.mxu0 }
 0x183   : > { %1631 = vst [vmem:[%s2394_s9 + $0x10] sm:$0xff] %v1621_v9 }
 0x184   : > { %v1478_v16 = vpop.f32.mrf.mxu1  ;;  %v1591_v5 = vpop.f32.mrf.mxu0 }
 0x185   : > { %v1622_v11 = vadd.f32 %v1591_v5, %v1501_v7  ;;  %v1503_v37 = vadd.f32 %v1478_v16, %v1340_v30 }
 0x186   : > { %v2140_v20 = vpop.f32.mrf.mxu1  ;;  %v2158_v21 = vpop.f32.mrf.mxu0 }
 0x187   : > { %1632 = vst [vmem:[%s2394_s9 + $0x18] sm:$0xff] %v1622_v11 }
 0x188   : > { %v1483_v12 = vpop.f32.mrf.mxu1  ;;  %v1596_v18 = vpop.f32.mrf.mxu0 }
 0x189   : > { %v1623_v31 = vadd.f32 %v1596_v18, %v1502_v24  ;;  %v1504_v46 = vadd.f32 %v1483_v12, %v1341_v39 }
 0x18a   : > { %v2143_v28 = vpop.f32.mrf.mxu1  ;;  %v2161_v4 = vpop.f32.mrf.mxu0 }
 0x18b   : > { %1633 = vst [vmem:[%s2394_s9 + $0x20] sm:$0xff] %v1623_v31 }
 0x18c   : > { %v1486_v15 = vpop.f32.mrf.mxu1  ;;  %v1599_v38 = vpop.f32.mrf.mxu0 }
 0x18d   : > { %v1624_v35 = vadd.f32 %v1599_v38, %v1503_v37  ;;  %v1505_v23 = vadd.f32 %v1486_v15, %v1342_v40 }
 0x18e   : > { %v2144_v10 = vpop.f32.mrf.mxu1  ;;  %v2162_v22 = vpop.f32.mrf.mxu0 }
 0x18f   : > { %1634 = vst [vmem:[%s2394_s9 + $0x28] sm:$0xff] %v1624_v35 }
 0x190   : > { %v1491_v32 = vpop.f32.mrf.mxu1  ;;  %v1604_v43 = vpop.f32.mrf.mxu0 }
 0x191   : > { %v1625_v14 = vadd.f32 %v1604_v43, %v1504_v46  ;;  %v1506_v54 = vadd.f32 %v1491_v32, %v1343_v45 }
 0x192   : > { %v2147_v42 = vpop.f32.mrf.mxu1  ;;  %v2165_v44 = vpop.f32.mrf.mxu0 }
 0x193   : > { %1635 = vst [vmem:[%s2394_s9 + $0x30] sm:$0xff] %v1625_v14 }
 0x194   : > { %v1494_v25 = vpop.f32.mrf.mxu1  ;;  %v1607_v48 = vpop.f32.mrf.mxu0 }
 0x195   : > { %v1626_v19 = vadd.f32 %v1607_v48, %v1505_v23  ;;  %v1507_v49 = vadd.f32 %v1494_v25, %v1344_v6 }
 0x196   : > { %v2166_v52 = vpop.f32.mrf.mxu0  ;;  %v2148_v53 = vpop.f32.mrf.mxu1 }
 0x197   : > { %1636 = vst [vmem:[%s2394_s9 + $0x38] sm:$0xff] %v1626_v19 }
 0x198   : > { %v1612_v29 = vpop.f32.mrf.mxu0 }
 0x199   : > { %v1627_v50 = vadd.f32 %v1612_v29, %v1506_v54 }
 0x19a   : > { %v2169_v51 = vpop.f32.mrf.mxu0 }
 0x19b   : > { %1637 = vst [vmem:[%s2394_s9 + $0x40] sm:$0xff] %v1627_v50 }
 0x19c   : > { %v1615_v58 = vpop.f32.mrf.mxu0 }
 0x19d   : > { %v1628_v60 = vadd.f32 %v1615_v58, %v1507_v49 }
 0x19e   : > { %v2170_v62 = vpop.f32.mrf.mxu0 }
 0x19f   : > { %1638 = vst [vmem:[%s2394_s9 + $0x48] sm:$0xff] %v1628_v60 }
 0x1a0 PF: > { %s13_s18 = sadd.s32 1, %s2317_s18   ;;  %s2836_s12 = smov %s2305_s15 }
 0x1a1   : > { %p10_p10 = scmp.ge.s32.totalorder %s13_s18, 50   ;;  %s2837_s13 = smov %s2309_s16 }
 0x1a2   : > { %s2838_s14 = smov %s2313_s17  ;;  %s2839_s15 = smov %s2843_s19 }
 0x1a3   : > { %s2840_s16 = smov %s2847_s20  ;;  %s2841_s17 = smov %s2851_s21 }
 0x1a4   :  { %12 = sbr.rel (!%p10_p10) target bundleno = 4 (0x4), region = 81 }

</bundles_post_ra>
